<compile_context>
chip_gen: v7x
topology: tpu7x:2x2x1
jax: 0.10.0
libtpu: 0.0.40
codegen_flags: <defaults>
</compile_context>

<pallas_src>
import functools

import jax
import jax.numpy as jnp
from jax import lax
from jax.experimental import pallas as pl
from jax.experimental.pallas import tpu as pltpu

EPS = 1e-5
_BLOCK_BUDGET = 2 * 1024 * 1024      # target bytes for the biggest per-step buffer


def _round_up(x, m):
    return (x + m - 1) // m * m


def _images_per_step(n, bytes_per_image, budget=_BLOCK_BUDGET):
    """Largest divisor of n whose per-step block stays under `budget`."""
    b = max(1, min(n, budget // max(bytes_per_image, 1)))
    while n % b:
        b -= 1
    return b


def _vmem_limit_bytes():
    # Re-derive per generation: v7x has 64 MiB physical VMEM, v5e/v6e have 128 MiB.
    try:
        cap = pltpu.get_tpu_info().vmem_capacity_bytes
        return min(64 * 1024 * 1024, (cap * 3) // 4)
    except Exception:
        return None


# --------------------------------------------------------------------------- #
# Phase 1: per-channel partial batch statistics over a chunk of B images.      #
# Each grid step writes its OWN (1, Cin, 1) partials -> "parallel" grid axis   #
# (both TensorCores on v7x); the tiny cross-chunk reduction happens in jnp.    #
# --------------------------------------------------------------------------- #
def _bn_stats_kernel(x_ref, sum_ref, sumsq_ref):
    x = x_ref[...].astype(jnp.float32)                   # (B, Cin, H*W), lane-dense
    s = jnp.sum(x, axis=2, keepdims=True)                # (B, Cin, 1)
    q = jnp.sum(x * x, axis=2, keepdims=True)
    sum_ref[...] = jnp.sum(s, axis=0, keepdims=True)     # (1, Cin, 1)
    sumsq_ref[...] = jnp.sum(q, axis=0, keepdims=True)


# --------------------------------------------------------------------------- #
# Phase 2: folded BN FMA + ReLU + im2col conv; B images per step, ONE matmul.  #
# --------------------------------------------------------------------------- #
def _bn_relu_conv_kernel(x_ref, scale_ref, shift_ref, w_ref, o_ref, *,
                         width, hw, kh_size, kw_size, pad, cin_pad):
    nb, cin, _ = x_ref.shape
    t = nb * hw                                          # lanes this step (B * H*W)

    # ---- folded BN FMA + ReLU (precomputed per-channel scale/shift, f32 math) ----
    x = x_ref[...].astype(jnp.float32)                   # (B, Cin, H*W)
    y3 = jnp.maximum(x * scale_ref[...] + shift_ref[...], 0.0)

    # Lane-concatenate the B images into one lane-dense (Cin, B*H*W) slab
    # (hw is a multiple of 128, so these are aligned full-tile placements).
    if nb > 1:
        y = jnp.concatenate([y3[b] for b in range(nb)], axis=1)
    else:
        y = y3[0]
    # Sublane-align every tap block: zero-pad channels to a multiple of 8
    # (matching zero weight columns are added in the wrapper).
    if cin_pad > cin:
        y = jnp.concatenate(
            [y, jnp.zeros((cin_pad - cin, t), jnp.float32)], axis=0)

    # ---- im2col boundary masks from a single iota + rem ----
    m = lax.broadcasted_iota(jnp.int32, (1, t), 1)       # block-local flat lane index
    pim = m % hw                                         # flat position within its image
    col = m % width                                      # column within its row

    # ---- build the (KH*KW*Cin_pad, B*H*W) patch in registers (bf16), XLU rolls ----
    pieces = []
    for kh in range(kh_size):
        for kw in range(kw_size):
            dh = kh - pad
            dw = kw - pad
            off = dh * width + dw
            # tap[c, m] = y[c, (m + off) % t]; every wrapped position (across an image
            # or block boundary) is out-of-image and masked to zero below.
            tap = y if off == 0 else pltpu.roll(y, (-off) % t, 1)
            conds = []
            if dh > 0:
                conds.append(pim < hw - dh * width)
            elif dh < 0:
                conds.append(pim >= (-dh) * width)
            if dw > 0:
                conds.append(col < width - dw)
            elif dw < 0:
                conds.append(col >= -dw)
            if conds:
                valid = conds[0]
                for c in conds[1:]:
                    valid = valid & c
                tap = jnp.where(valid, tap, 0.0)
            pieces.append(tap.astype(jnp.bfloat16))       # single f32->bf16 cast per tap
    patches = jnp.concatenate(pieces, axis=0)             # (K_pad, B*H*W) bf16

    # ---- ONE deep MXU matmul per step: (Cout, K_pad) @ (K_pad, B*H*W) ----
    out = jnp.dot(w_ref[...], patches, preferred_element_type=jnp.float32)

    # Scatter back to the NCHW-native output block (lane-aligned, full-width slices).
    for b in range(nb):
        o_ref[b] = out[:, b * hw:(b + 1) * hw].astype(o_ref.dtype)


def bn_relu_conv(x_nchw, gamma, beta, weight_oihw, *, stride=1, padding=1):
    """Forward of bn_relu_conv. x_nchw: (N, Cin, H, W); weight_oihw: (Cout, Cin, KH, KW)."""
    n, cin, h, w = x_nchw.shape
    cout, wcin, kh, kw = weight_oihw.shape
    assert wcin == cin
    h_out = (h + 2 * padding - kh) // stride + 1
    w_out = (w + 2 * padding - kw) // stride + 1
    # TODO(synk): only stride-1 "same" convs are supported (all DenseNet-CIFAR10 uses).
    assert stride == 1 and h_out == h and w_out == w, "stride-1 'same' conv only"

    hw = h * w
    cin_pad = _round_up(cin, 8)        # sublane-aligned tap rows (16 is ideal for bf16
    ktot = kh * kw * cin_pad           # patches, but 4x padding at tiny Cin isn't worth it)
    vmem_limit = _vmem_limit_bytes()

    # Free layout plumbing only; activations are never transposed.
    x_flat = x_nchw.reshape(n, cin, hw)

    # Conv weight: (Cout, Cin, KH, KW) -> zero-pad Cin -> (Cout, KH*KW*Cin_pad), bf16,
    # row order (kh, kw, cin) matching the tap-major im2col build.
    w_p = weight_oihw
    if cin_pad > cin:
        w_p = jnp.pad(w_p, ((0, 0), (0, cin_pad - cin), (0, 0), (0, 0)))
    w_mat = jnp.transpose(w_p, (0, 2, 3, 1)).reshape(cout, ktot).astype(jnp.bfloat16)

    # -------- phase 1: partial per-channel stats, B1 images per "parallel" step --------
    b1 = _images_per_step(n, cin * hw * 4)
    n_chunks = n // b1
    part_sum, part_sq = pl.pallas_call(
        _bn_stats_kernel,
        out_shape=(jax.ShapeDtypeStruct((n_chunks, cin, 1), jnp.float32),
                   jax.ShapeDtypeStruct((n_chunks, cin, 1), jnp.float32)),
        grid=(n_chunks,),
        in_specs=[pl.BlockSpec((b1, cin, hw), lambda i: (i, 0, 0))],
        out_specs=(pl.BlockSpec((1, cin, 1), lambda i: (i, 0, 0)),
                   pl.BlockSpec((1, cin, 1), lambda i: (i, 0, 0))),
        compiler_params=pltpu.CompilerParams(
            dimension_semantics=("parallel",)),
    )(x_flat)

    # -------- fold BN into one per-channel FMA (tiny, plain jnp between the calls) -----
    count = jnp.float32(n * hw)
    ch_sum = jnp.sum(part_sum, axis=0)                 # (Cin, 1)
    ch_sq = jnp.sum(part_sq, axis=0)
    mean = ch_sum / count
    # TODO(synk): E[x^2]-E[x]^2 in f32 can cancel when |mean| >> std; fine for inference.
    var = ch_sq / count - mean * mean                  # biased variance (training-mode BN)
    scale = gamma.reshape(cin, 1).astype(jnp.float32) * lax.rsqrt(var + EPS)
    shift = beta.reshape(cin, 1).astype(jnp.float32) - mean * scale

    # -------- phase 2: BN-apply + ReLU + conv, B images and ONE matmul per step --------
    per_image = max(cin * hw * 4, ktot * hw * 2, cout * hw * 4)
    b2 = _images_per_step(n, per_image)
    kernel = functools.partial(
        _bn_relu_conv_kernel, width=w, hw=hw, kh_size=kh, kw_size=kw,
        pad=padding, cin_pad=cin_pad)

    out_flat = pl.pallas_call(
        kernel,
        out_shape=jax.ShapeDtypeStruct((n, cout, hw), x_nchw.dtype),
        grid=(n // b2,),
        in_specs=[
            # TODO(synk): add pipeline_mode=pl.Buffered(3) on x if profiling shows the
            #             larger per-step x DMA exposed (most relevant on v5e).
            pl.BlockSpec((b2, cin, hw), lambda i: (i, 0, 0)),   # x, B images per step
            pl.BlockSpec((cin, 1), lambda i: (0, 0)),           # folded BN scale
            pl.BlockSpec((cin, 1), lambda i: (0, 0)),           # folded BN shift
            pl.BlockSpec((cout, ktot), lambda i: (0, 0)),       # conv weight (bf16)
        ],
        out_specs=pl.BlockSpec((b2, cout, hw), lambda i: (i, 0, 0)),
        compiler_params=pltpu.CompilerParams(
            dimension_semantics=("parallel",),
            vmem_limit_bytes=vmem_limit),
    )(x_flat, scale, shift, w_mat)

    return out_flat.reshape(n, cout, h, w)                      # free reshape to NCHW


def _reference(x, gamma, beta, weight, stride, padding):
    mean = jnp.mean(x, axis=(0, 2, 3), keepdims=True)
    var = jnp.mean((x - mean) ** 2, axis=(0, 2, 3), keepdims=True)
    y = (x - mean) / jnp.sqrt(var + EPS) * gamma.reshape(1, -1, 1, 1) \
        + beta.reshape(1, -1, 1, 1)
    y = jnp.maximum(y, 0.0)
    return lax.conv_general_dilated(
        y, weight, (stride, stride), [(padding, padding)] * 2,
        dimension_numbers=('NCHW', 'OIHW', 'NCHW'))


if __name__ == "__main__":
    # Small shapes consistent with the module: nin=4, nout=8, kernel=3, stride=1, pad=1.
    N, CIN, COUT, H, W, K, STRIDE, PAD = 2, 4, 8, 16, 16, 3, 1, 1

    key = jax.random.PRNGKey(0)
    kx, kw_, kg, kb = jax.random.split(key, 4)

    x = jax.random.normal(kx, (N, CIN, H, W), dtype=jnp.float32)
    # Conv2d default init: uniform(-1/sqrt(fan_in), 1/sqrt(fan_in)), fan_in = CIN*K*K.
    bound = 1.0 / jnp.sqrt(jnp.float32(CIN * K * K))
    weight = jax.random.uniform(kw_, (COUT, CIN, K, K), jnp.float32, -bound, bound)
    # BatchNorm affine params (defaults gamma=1, beta=0; perturb to exercise broadcast).
    gamma = 1.0 + 0.1 * jax.random.normal(kg, (CIN,), dtype=jnp.float32)
    beta = 0.1 * jax.random.normal(kb, (CIN,), dtype=jnp.float32)

    out = bn_relu_conv(x, gamma, beta, weight, stride=STRIDE, padding=PAD)
    out = jax.block_until_ready(out)

    ref = _reference(x, gamma, beta, weight, STRIDE, PAD)
    assert out.shape == ref.shape == (N, COUT, H, W)
    # bf16 MXU operands (f32 accumulation) -> compare at bf16-level tolerance.
    assert jnp.allclose(out, ref, atol=2e-2, rtol=2e-2), \
        f"max abs diff = {jnp.max(jnp.abs(out - ref))}"

    print("KERNEL_OK")
</pallas_src>

<mosaic_0001>
module attributes {stable_mosaic.version = 11 : i64} {
  func.func @_bn_stats_kernel(%arg0: i32, %arg1: memref<2x4x256xf32, #tpu.memory_space<vmem>>, %arg2: memref<1x4x1xf32, #tpu.memory_space<vmem>>, %arg3: memref<1x4x1xf32, #tpu.memory_space<vmem>>) attributes {dimension_semantics = [#tpu.dimension_semantics<parallel>], iteration_bounds = array<i64: 1>, scalar_prefetch = 0 : i64, scratch_operands = 0 : i64, tpu.core_type = #tpu.core_type<tc>, window_params = [{transform_indices = @transform_0, window_bounds = array<i64: 2, 4, 256>}, {transform_indices = @transform_1, window_bounds = array<i64: 1, 4, 1>}, {transform_indices = @transform_2, window_bounds = array<i64: 1, 4, 1>}]} {
    %c0 = arith.constant 0 : index
    %c0_0 = arith.constant 0 : index
    %c0_1 = arith.constant 0 : index
    %0 = vector.load %arg1[%c0, %c0_0, %c0_1] : memref<2x4x256xf32, #tpu.memory_space<vmem>>, vector<2x4x256xf32>
    %cst = arith.constant dense<0.000000e+00> : vector<2x4xf32>
    %1 = vector.multi_reduction <add>, %0, %cst [2] : vector<2x4x256xf32> to vector<2x4xf32>
    %2 = vector.shape_cast %1 : vector<2x4xf32> to vector<2x4x1xf32>
    %3 = arith.mulf %0, %0 : vector<2x4x256xf32>
    %cst_2 = arith.constant dense<0.000000e+00> : vector<2x4xf32>
    %4 = vector.multi_reduction <add>, %3, %cst_2 [2] : vector<2x4x256xf32> to vector<2x4xf32>
    %5 = vector.shape_cast %4 : vector<2x4xf32> to vector<2x4x1xf32>
    %cst_3 = arith.constant dense<0.000000e+00> : vector<4x1xf32>
    %6 = vector.multi_reduction <add>, %2, %cst_3 [0] : vector<2x4x1xf32> to vector<4x1xf32>
    %7 = vector.shape_cast %6 : vector<4x1xf32> to vector<1x4x1xf32>
    %c0_4 = arith.constant 0 : index
    %c0_5 = arith.constant 0 : index
    %c0_6 = arith.constant 0 : index
    %8 = vector.load %arg2[%c0_4, %c0_5, %c0_6] : memref<1x4x1xf32, #tpu.memory_space<vmem>>, vector<1x4x1xf32>
    tpu.vector_store %arg2[%c0_4, %c0_5, %c0_6], %7 {strides = array<i32>} : memref<1x4x1xf32, #tpu.memory_space<vmem>>, vector<1x4x1xf32>,
    %cst_7 = arith.constant dense<0.000000e+00> : vector<4x1xf32>
    %9 = vector.multi_reduction <add>, %5, %cst_7 [0] : vector<2x4x1xf32> to vector<4x1xf32>
    %10 = vector.shape_cast %9 : vector<4x1xf32> to vector<1x4x1xf32>
    %c0_8 = arith.constant 0 : index
    %c0_9 = arith.constant 0 : index
    %c0_10 = arith.constant 0 : index
    %11 = vector.load %arg3[%c0_8, %c0_9, %c0_10] : memref<1x4x1xf32, #tpu.memory_space<vmem>>, vector<1x4x1xf32>
    tpu.vector_store %arg3[%c0_8, %c0_9, %c0_10], %10 {strides = array<i32>} : memref<1x4x1xf32, #tpu.memory_space<vmem>>, vector<1x4x1xf32>,
    return
  }
  func.func @transform_0(%arg0: i32) -> (i32, i32, i32) {
    %c0_i32 = arith.constant 0 : i32
    %c0_i32_0 = arith.constant 0 : i32
    %c0_i32_1 = arith.constant 0 : i32
    return %arg0, %c0_i32, %c0_i32_0 : i32, i32, i32
  }
  func.func @transform_1(%arg0: i32) -> (i32, i32, i32) {
    %c0_i32 = arith.constant 0 : i32
    %c0_i32_0 = arith.constant 0 : i32
    %c0_i32_1 = arith.constant 0 : i32
    return %arg0, %c0_i32, %c0_i32_0 : i32, i32, i32
  }
  func.func @transform_2(%arg0: i32) -> (i32, i32, i32) {
    %c0_i32 = arith.constant 0 : i32
    %c0_i32_0 = arith.constant 0 : i32
    %c0_i32_1 = arith.constant 0 : i32
    return %arg0, %c0_i32, %c0_i32_0 : i32, i32, i32
  }
}

</mosaic_0001>

<bundles_post_ra>
// kernel: tpu_custom_call.1
= control target key start
LH: loop header
LB: loop body
LE: loop exit
PB: predicated region body
PF: predicated region fallthrough
CT: control target
= control target key end

     0   :  { %8 = vsyncpa [#allocation3], 0  ;;  %s108_s9 = smov [#allocation2]   ;;  %s156_s0 = inlined_call_operand.hbm [shape: f32[2,4,256], index: 0, kind: input, shape index: {}]   ;;  %s157_s1 = inlined_call_operand.vmem [shape: f32[1,4,1], index: 1, kind: output, shape index: {0}]   ;;  %s158_s2 = inlined_call_operand.vmem [shape: f32[1,4,1], index: 2, kind: output, shape index: {1}]  }
   0x1   :  { %s14_s10 = sshll.u32 %s108_s9, 4  ;;  %s84_s13 = scalar_lea.hbm %s156_s0, 256  ;;  %s15_s10 = int_to_ptr.vmem [resolvable:$true] %s14_s10 }
   0x2   :  { %p85_p0 = scmp.ne.s32.totalorder %s156_s0, %s84_s13  ;;  %p88_p1 = scmp.lt.u32.totalorder %s84_s13, %s156_s0 }
   0x4   :  { %p90_p2 = pnand %p88_p1, %p85_p0 }
   0x6   :  { %93 = shalt.err (!%p90_p2)
}
   0x7   :  { %s94_s18 = scalar_lea.vmem %s15_s10, 256  ;;  %p99_p4 = scmp.lt.s32.totalorder %s15_s10, %s15_s10 }
   0x8   :  { %p95_p3 = scmp.ne.s32.totalorder %s15_s10, %s94_s18  ;;  %p100_p5 = scmp.lt.s32.totalorder %s94_s18, %s94_s18 }
   0xa   :  { %p101_p6 = por %p100_p5, %p99_p4 }
   0xc   :  { %p102_p7 = pnand %p101_p6, %p95_p3 }
   0xe   :  { %105 = shalt.err (!%p102_p7)
}
   0xf   :  { %s109_s19 = smov 128   ;;  %s110_s20 = smov 8  }
  0x10   :  { %20 = dma.hbm_to_vmem [thread:$0]  %s156_s0, 256, %s15_s10, [#allocation3], %s109_s19, %s109_s19, %s110_s20  }
  0x11   :  { %106 = dma.done.wait [#allocation3], 256  }
  0x12   :  { %107 = vsyncadd [#allocation3], 4294967040  ;;  %vm32_vm0 = vcmask 1043456   ;;  %v24_v0 = vld [vmem:[#allocation2] sm:$0xff]  ;;  %v25_v1 = vld [vmem:[#allocation2 + $0x8] sm:$0xff]  ;;  %vm64_vm1 = vcmask 3072  }
  0x13   :  { %v28_v2 = vcombine.high %v24_v0, %v24_v0  ;;  %v33_v3 = vsel %vm32_vm0, %v24_v0, 0.0  ;;  %v43_v4 = vmul.f32 %v24_v0, %v24_v0  ;;  %v29_v5 = vcombine.high %v25_v1, %v25_v1 }
  0x14   :  { %v38_v6 = vsel %vm32_vm0, %v25_v1, 0.0  ;;  %v44_v7 = vmul.f32 %v25_v1, %v25_v1 }
  0x15   :  { %v34_v8 = vsel %vm32_vm0, %v28_v2, 0.0  ;;  %v47_v9 = vcombine.high %v43_v4, %v43_v4  ;;  %v51_v10 = vsel %vm32_vm0, %v43_v4, 0.0  ;;  %v39_v11 = vsel %vm32_vm0, %v29_v5, 0.0 }
  0x16   :  { %v35_v12 = vadd.f32 %v34_v8, %v33_v3  ;;  %v48_v13 = vcombine.high %v44_v7, %v44_v7  ;;  %v56_v15 = vsel %vm32_vm0, %v44_v7, 0.0  ;;  %v40_v17 = vadd.f32 %v39_v11, %v38_v6 }
  0x17   :  { %v52_v14 = vsel %vm32_vm0, %v47_v9, 0.0 }
  0x18   :  { %36 = vadd.xlane.f32.xlu0 %v35_v12  ;;  %v53_v16 = vadd.f32 %v52_v14, %v51_v10  ;;  %v57_v18 = vsel %vm32_vm0, %v48_v13, 0.0 }
  0x19   :  { %v58_v19 = vadd.f32 %v57_v18, %v56_v15 }
  0x1a   :  { %54 = vadd.xlane.f32.xlu1 %v53_v16 }
  0x1c   :  { %41 = vadd.xlane.f32.xlu0 %v40_v17 }
  0x1e   :  { %59 = vadd.xlane.f32.xlu1 %v58_v19 }
  0xa5   :  { %v37_v20 = vpop.xlane.xlu0 %36 }
  0xa6   :  { %v61_v23 = vsel %vm32_vm0, %v37_v20, 0.0 }
  0xa7   :  { %v55_v21 = vpop.xlane.xlu1 %54 }
  0xa8   :  { %v66_v27 = vsel %vm32_vm0, %v55_v21, 0.0 }
  0xa9   :  { %v42_v22 = vpop.xlane.xlu0 %41 }
  0xaa   :  { %v62_v24 = vsel %vm32_vm0, %v42_v22, 0.0 }
  0xab   :  { %v63_v25 = vadd.f32 %v62_v24, %v61_v23  ;;  %v60_v26 = vpop.xlane.xlu1 %59 }
  0xac   :  { %v67_v28 = vsel %vm32_vm0, %v60_v26, 0.0 }
  0xad   :  { %65 = vst.msk [vmem:[%s157_s1] sm:$0xf] %vm64_vm1, %v63_v25  ;;  %v68_v29 = vadd.f32 %v67_v28, %v66_v27 }
  0xaf   :  { %69 = vst.msk [vmem:[%s158_s2] sm:$0xf] %vm64_vm1, %v68_v29 }
  0xb0   :  { %78 = vsyncpa [#allocation3], 1 }

</bundles_post_ra>
